<compile_context>
chip_gen: v6e
topology: v6e:2x2x1
jax: 0.10.0
libtpu: 0.0.40
codegen_flags: <defaults>
</compile_context>

<pallas_src>
import jax
import jax.numpy as jnp
from jax.experimental import pallas as pl
from jax.experimental.pallas import tpu as pltpu

# ---- config (args.numROI, args.embCh) ----
B = 2            # number of graphs in the batch
R = 16           # args.numROI  (nodes per graph == input feature dim)
C1 = 32          # args.embCh[0]
C2 = 16          # args.embCh[1]
READ = 8         # read_out_mlp output width
DHID = 64        # domain_classifier hidden width
HEAD = 8         # fused head width: 2 (fc2) + 6 (domain)
N = B * R        # total nodes in the batch
BN_EPS = 1e-5

# ---- weight-slab row layout (all row offsets are multiples of 8) ----
W_LANES = 64
OFF_W1 = 0                      # (R,  C1)   = (16, 32)
OFF_W2 = OFF_W1 + R             # (C1, C2)   = (32, 16)
OFF_WR = OFF_W2 + C1            # (C2, READ) = (16, 8)
OFF_WEXP = OFF_WR + C2          # (READ*N, R)= (256, 16)  8 blocks of (32,16)
OFF_SEL = OFF_WEXP + READ * N   # (B, N)     = (2, 32)   padded to 8 rows
OFF_WD1 = OFF_SEL + 8           # (R, DHID)  = (16, 64)
OFF_WHM = OFF_WD1 + R           # (R, HEAD)  fc2 padded into cols 0:2
OFF_WHD = OFF_WHM + R           # (DHID, HEAD) wd2 padded into cols 2:8
W_ROWS = OFF_WHD + DHID         # = 424  (multiple of 8)


def _mish(x):
    # mish(x) = x * tanh(softplus(x)), numerically stable softplus
    sp = jnp.maximum(x, 0.0) + jnp.log1p(jnp.exp(-jnp.abs(x)))
    return x * jnp.tanh(sp)


# --------------------------- the fused kernel -------------------------------
def gcnr_kernel(d_ref, w_ref, b_ref, out_ref):
    f32 = jnp.float32
    a = d_ref[0:N, :]                 # (N, N)  block-diag D^-1/2 (A+I) D^-1/2
    x = d_ref[N:2 * N, 0:R]           # (N, R)  node features for the batch

    # bias / affine rows (static single-row ref loads)
    b1 = b_ref[0:1, 0:C1]
    b2 = b_ref[1:2, 0:C2]
    br = b_ref[2:3, 0:READ]
    bf1 = b_ref[3:4, 0:R]
    gamma = b_ref[4:5, 0:R]
    beta = b_ref[5:6, 0:R]
    bd1 = b_ref[6:7, 0:DHID]
    bhead = b_ref[7:8, 0:HEAD]

    # GCNConv1: (A_hat @ x) @ W1 + b1, then Mish
    h = jnp.dot(a, x, preferred_element_type=f32)
    h = jnp.dot(h, w_ref[OFF_W1:OFF_W1 + R, 0:C1], preferred_element_type=f32) + b1
    h = _mish(h)                                            # (N, C1)
    # GCNConv2
    h = jnp.dot(a, h, preferred_element_type=f32)
    h = jnp.dot(h, w_ref[OFF_W2:OFF_W2 + C1, 0:C2], preferred_element_type=f32) + b2
    h = _mish(h)                                            # (N, C2)
    # read_out_mlp + Mish
    out = jnp.dot(h, w_ref[OFF_WR:OFF_WR + C2, 0:READ], preferred_element_type=f32) + br
    out = _mish(out)                                        # (N, READ)

    # fc1 applied to out.reshape(B, R*READ) without materializing the reshape:
    #   z[n, o] = sum_j out[n, j] * Wf1[(n % R)*READ + j, o]
    #   y[b, o] = sum_{n in graph b} z[n, o]                 (Sel @ z)
    z = out[:, 0:1] * w_ref[OFF_WEXP:OFF_WEXP + N, 0:R]
    for j in range(1, READ):
        z = z + out[:, j:j + 1] * w_ref[OFF_WEXP + j * N:OFF_WEXP + (j + 1) * N, 0:R]
    y = jnp.dot(w_ref[OFF_SEL:OFF_SEL + B, 0:N], z, preferred_element_type=f32) + bf1

    # BatchNorm1d training-mode forward: per-feature batch stats, biased var.
    mean = jnp.mean(y, axis=0, keepdims=True)
    var = jnp.mean((y - mean) ** 2, axis=0, keepdims=True)
    yn = (y - mean) * jax.lax.rsqrt(var + BN_EPS)
    mid = _mish(yn * gamma + beta)                          # middle_logits (B, R)

    # domain-classifier hidden layer (grad_reverse is identity in fwd)
    d = jnp.maximum(
        jnp.dot(mid, w_ref[OFF_WD1:OFF_WD1 + R, 0:DHID], preferred_element_type=f32) + bd1,
        0.0)                                                # (B, DHID)

    # fused head: cols 0:2 = fc2 logits, cols 2:8 = domain logits — one store.
    out_ref[...] = (
        jnp.dot(mid, w_ref[OFF_WHM:OFF_WHM + R, 0:HEAD], preferred_element_type=f32)
        + jnp.dot(d, w_ref[OFF_WHD:OFF_WHD + DHID, 0:HEAD], preferred_element_type=f32)
        + bhead)


def gcnr_forward(dslab, wslab, bslab):
    vmem = pltpu.MemorySpace.VMEM
    flops = 2 * (N * N * R + N * R * C1 + N * N * C1 + N * C1 * C2 + N * C2 * READ
                 + READ * N * R + B * N * R + B * R * DHID
                 + B * R * HEAD + B * DHID * HEAD)
    transcendentals = 3 * (N * C1 + N * C2 + N * READ + B * R)
    bytes_accessed = 4 * (dslab.size + wslab.size + bslab.size + B * HEAD)
    head = pl.pallas_call(
        gcnr_kernel,
        out_shape=jax.ShapeDtypeStruct((B, HEAD), jnp.float32),
        in_specs=[pl.BlockSpec(memory_space=vmem),
                  pl.BlockSpec(memory_space=vmem),
                  pl.BlockSpec(memory_space=vmem)],
        out_specs=pl.BlockSpec(memory_space=vmem),
        cost_estimate=pl.CostEstimate(flops=flops,
                                      transcendentals=transcendentals,
                                      bytes_accessed=bytes_accessed),
    )(dslab, wslab, bslab)
    logits = head[:, 0:2]
    cls_logits = head[:, 2:HEAD]
    return logits, cls_logits


# ---------------- glue: synthetic graph + GCN normalization ----------------
def build_normalized_adjacency(key):
    # Dense weighted adjacency per graph (densified (edge_index, edge_attr)):
    # symmetric, no self loops; then GCN norm with self-loop weight 1.
    w = jax.random.uniform(key, (B, R, R), dtype=jnp.float32)
    a = 0.5 * (w + jnp.swapaxes(w, 1, 2))
    a = a * (1.0 - jnp.eye(R, dtype=jnp.float32))
    a = a + jnp.eye(R, dtype=jnp.float32)          # add_self_loops
    deg = jnp.sum(a, axis=-1)                      # weighted degree (B, R)
    dinv = jax.lax.rsqrt(deg)
    return a * dinv[:, :, None] * dinv[:, None, :]


def _linear_params(key, fan_in, fan_out):
    k1, k2 = jax.random.split(key)
    bound = 1.0 / float(fan_in) ** 0.5
    w = jax.random.uniform(k1, (fan_in, fan_out), minval=-bound, maxval=bound,
                           dtype=jnp.float32)
    b = jax.random.uniform(k2, (1, fan_out), minval=-bound, maxval=bound,
                           dtype=jnp.float32)
    return w, b


def _place(slab, arr, row):
    r, c = arr.shape
    return slab.at[row:row + r, 0:c].set(arr)


def pack_operands(a_bd, x, w1, b1, w2, b2, wr, br, wf1, bf1, gamma, beta,
                  wf2, bf2, wd1, bd1, wd2, bd2):
    # data slab: rows 0:N = a_bd, rows N:2N (cols 0:R) = x
    dslab = jnp.zeros((2 * N, N), jnp.float32)
    dslab = _place(dslab, a_bd, 0)
    dslab = _place(dslab, x, N)

    # fc1 weight expanded so fc1(out.reshape(B, R*8)) needs no in-kernel
    # reshape:  wexp[j, node, o] = wf1[(node % R)*READ + j, o]
    wexp = jnp.tile(wf1.reshape(R, READ, R).transpose(1, 0, 2), (1, B, 1))
    wexp_flat = wexp.reshape(READ * N, R)
    # graph-sum selector: sel[b, node] = 1 iff node belongs to graph b
    sel = jnp.repeat(jnp.eye(B, dtype=jnp.float32), R, axis=1)
    # fused head weights (zero-padded so one matmul pair yields both outputs)
    wf2_pad = jnp.zeros((R, HEAD), jnp.float32).at[:, 0:2].set(wf2)
    wd2_pad = jnp.zeros((DHID, HEAD), jnp.float32).at[:, 2:HEAD].set(wd2)
    bhead = jnp.concatenate([bf2, bd2], axis=1)            # (1, 8)

    wslab = jnp.zeros((W_ROWS, W_LANES), jnp.float32)
    wslab = _place(wslab, w1, OFF_W1)
    wslab = _place(wslab, w2, OFF_W2)
    wslab = _place(wslab, wr, OFF_WR)
    wslab = _place(wslab, wexp_flat, OFF_WEXP)
    wslab = _place(wslab, sel, OFF_SEL)
    wslab = _place(wslab, wd1, OFF_WD1)
    wslab = _place(wslab, wf2_pad, OFF_WHM)
    wslab = _place(wslab, wd2_pad, OFF_WHD)

    bslab = jnp.zeros((8, W_LANES), jnp.float32)
    bslab = _place(bslab, b1, 0)
    bslab = _place(bslab, b2, 1)
    bslab = _place(bslab, br, 2)
    bslab = _place(bslab, bf1, 3)
    bslab = _place(bslab, gamma, 4)
    bslab = _place(bslab, beta, 5)
    bslab = _place(bslab, bd1, 6)
    bslab = _place(bslab, bhead, 7)
    return dslab, wslab, bslab


if __name__ == "__main__":
    key = jax.random.PRNGKey(0)
    ks = jax.random.split(key, 12)

    # load.x : [B*R, numROI] node features; load.batch implicit in layout
    x = jax.random.normal(ks[0], (N, R), dtype=jnp.float32)
    a_hat = build_normalized_adjacency(ks[1])      # (B, R, R)

    # block-diagonal A_hat so the whole batch propagates with a single matmul
    a_bd = jnp.zeros((N, N), jnp.float32)
    for b in range(B):
        a_bd = a_bd.at[b * R:(b + 1) * R, b * R:(b + 1) * R].set(a_hat[b])

    # deterministic synthetic parameters (shapes from the module __init__)
    w1, b1 = _linear_params(ks[2], R, C1)          # GCNConv(numROI, embCh[0])
    w2, b2 = _linear_params(ks[3], C1, C2)         # GCNConv(embCh[0], embCh[1])
    wr, br = _linear_params(ks[4], C2, READ)       # read_out_mlp
    wf1, bf1 = _linear_params(ks[5], READ * R, R)  # fc1
    gamma = jnp.ones((1, R), jnp.float32)          # bn1.weight
    beta = jnp.zeros((1, R), jnp.float32)          # bn1.bias
    wf2, bf2 = _linear_params(ks[6], R, 2)         # fc2
    wd1, bd1 = _linear_params(ks[7], R, DHID)      # domain_classifier[0]
    wd2, bd2 = _linear_params(ks[8], DHID, 6)      # domain_classifier[2]

    dslab, wslab, bslab = pack_operands(a_bd, x, w1, b1, w2, b2, wr, br,
                                        wf1, bf1, gamma, beta, wf2, bf2,
                                        wd1, bd1, wd2, bd2)

    logits, cls_logits = gcnr_forward(dslab, wslab, bslab)
    jax.block_until_ready((logits, cls_logits))

    # ---- pure-JAX reference of the same forward pass (sanity check) ----
    h = _mish(a_bd @ (x @ w1) + b1)
    h = _mish(a_bd @ (h @ w2) + b2)
    out = _mish(h @ wr + br)
    feat = out.reshape(B, R * READ)
    y = feat @ wf1 + bf1
    mean = jnp.mean(y, axis=0, keepdims=True)
    var = jnp.mean((y - mean) ** 2, axis=0, keepdims=True)
    mid = _mish((y - mean) * jax.lax.rsqrt(var + BN_EPS) * gamma + beta)
    lg_ref = mid @ wf2 + bf2
    cl_ref = jnp.maximum(mid @ wd1 + bd1, 0.0) @ wd2 + bd2

    assert logits.shape == (B, 2) and cls_logits.shape == (B, 6)
    assert jnp.allclose(logits, lg_ref, atol=5e-3, rtol=1e-3)
    assert jnp.allclose(cls_logits, cl_ref, atol=5e-3, rtol=1e-3)
    print("KERNEL_OK")
</pallas_src>

<mosaic_0001>
module attributes {stable_mosaic.version = 11 : i64} {
  func.func @gcnr_kernel(%arg0: memref<64x32xf32, #tpu.memory_space<vmem>>, %arg1: memref<424x64xf32, #tpu.memory_space<vmem>>, %arg2: memref<8x64xf32, #tpu.memory_space<vmem>>, %arg3: memref<2x8xf32, #tpu.memory_space<vmem>>) attributes {dimension_semantics = [], scalar_prefetch = 0 : i64, scratch_operands = 0 : i64, tpu.core_type = #tpu.core_type<tc>} {
    %c0 = arith.constant 0 : index
    %c0_0 = arith.constant 0 : index
    %0 = vector.load %arg0[%c0, %c0_0] : memref<64x32xf32, #tpu.memory_space<vmem>>, vector<32x32xf32>
    %c32 = arith.constant 32 : index
    %c0_1 = arith.constant 0 : index
    %1 = vector.load %arg0[%c32, %c0_1] : memref<64x32xf32, #tpu.memory_space<vmem>>, vector<32x16xf32>
    %c0_2 = arith.constant 0 : index
    %c0_3 = arith.constant 0 : index
    %2 = vector.load %arg2[%c0_2, %c0_3] : memref<8x64xf32, #tpu.memory_space<vmem>>, vector<1x32xf32>
    %c1 = arith.constant 1 : index
    %c0_4 = arith.constant 0 : index
    %3 = vector.load %arg2[%c1, %c0_4] : memref<8x64xf32, #tpu.memory_space<vmem>>, vector<1x16xf32>
    %c2 = arith.constant 2 : index
    %c0_5 = arith.constant 0 : index
    %4 = vector.load %arg2[%c2, %c0_5] : memref<8x64xf32, #tpu.memory_space<vmem>>, vector<1x8xf32>
    %c3 = arith.constant 3 : index
    %c0_6 = arith.constant 0 : index
    %5 = vector.load %arg2[%c3, %c0_6] : memref<8x64xf32, #tpu.memory_space<vmem>>, vector<1x16xf32>
    %c4 = arith.constant 4 : index
    %c0_7 = arith.constant 0 : index
    %6 = vector.load %arg2[%c4, %c0_7] : memref<8x64xf32, #tpu.memory_space<vmem>>, vector<1x16xf32>
    %c5 = arith.constant 5 : index
    %c0_8 = arith.constant 0 : index
    %7 = vector.load %arg2[%c5, %c0_8] : memref<8x64xf32, #tpu.memory_space<vmem>>, vector<1x16xf32>
    %c6 = arith.constant 6 : index
    %c0_9 = arith.constant 0 : index
    %8 = vector.load %arg2[%c6, %c0_9] : memref<8x64xf32, #tpu.memory_space<vmem>>, vector<1x64xf32>
    %c7 = arith.constant 7 : index
    %c0_10 = arith.constant 0 : index
    %9 = vector.load %arg2[%c7, %c0_10] : memref<8x64xf32, #tpu.memory_space<vmem>>, vector<1x8xf32>
    %cst = arith.constant dense<0.000000e+00> : vector<32x16xf32>
    %10 = tpu.matmul %0, %1, %cst {dimension_numbers = #tpu.dot_dimension_numbers<[1], [0], [0], [1], [0, 0, 1, 1], [], []>} : vector<32x32xf32>, vector<32x16xf32>, vector<32x16xf32> -> vector<32x16xf32>
    %c0_11 = arith.constant 0 : index
    %c0_12 = arith.constant 0 : index
    %11 = vector.load %arg1[%c0_11, %c0_12] : memref<424x64xf32, #tpu.memory_space<vmem>>, vector<16x32xf32>
    %cst_13 = arith.constant dense<0.000000e+00> : vector<32x32xf32>
    %12 = tpu.matmul %10, %11, %cst_13 {dimension_numbers = #tpu.dot_dimension_numbers<[1], [0], [0], [1], [0, 0, 1, 1], [], []>} : vector<32x16xf32>, vector<16x32xf32>, vector<32x32xf32> -> vector<32x32xf32>
    %13 = vector.broadcast %2 : vector<1x32xf32> to vector<32x32xf32>
    %14 = arith.addf %12, %13 : vector<32x32xf32>
    %cst_14 = arith.constant 0.000000e+00 : f32
    %15 = vector.broadcast %cst_14 : f32 to vector<32x32xf32>
    %16 = arith.maximumf %14, %15 : vector<32x32xf32>
    %17 = math.absf %14 : vector<32x32xf32>
    %cst_15 = arith.constant 0.000000e+00 : f32
    %18 = vector.broadcast %cst_15 : f32 to vector<32x32xf32>
    %19 = arith.subf %18, %17 : vector<32x32xf32>
    %20 = math.exp %19 : vector<32x32xf32>
    %21 = math.log1p %20 : vector<32x32xf32>
    %22 = arith.addf %16, %21 : vector<32x32xf32>
    %23 = math.tanh %22 : vector<32x32xf32>
    %24 = arith.mulf %14, %23 : vector<32x32xf32>
    %cst_16 = arith.constant dense<0.000000e+00> : vector<32x32xf32>
    %25 = tpu.matmul %0, %24, %cst_16 {dimension_numbers = #tpu.dot_dimension_numbers<[1], [0], [0], [1], [0, 0, 1, 1], [], []>} : vector<32x32xf32>, vector<32x32xf32>, vector<32x32xf32> -> vector<32x32xf32>
    %c16 = arith.constant 16 : index
    %c0_17 = arith.constant 0 : index
    %26 = vector.load %arg1[%c16, %c0_17] : memref<424x64xf32, #tpu.memory_space<vmem>>, vector<32x16xf32>
    %cst_18 = arith.constant dense<0.000000e+00> : vector<32x16xf32>
    %27 = tpu.matmul %25, %26, %cst_18 {dimension_numbers = #tpu.dot_dimension_numbers<[1], [0], [0], [1], [0, 0, 1, 1], [], []>} : vector<32x32xf32>, vector<32x16xf32>, vector<32x16xf32> -> vector<32x16xf32>
    %28 = vector.broadcast %3 : vector<1x16xf32> to vector<32x16xf32>
    %29 = arith.addf %27, %28 : vector<32x16xf32>
    %cst_19 = arith.constant 0.000000e+00 : f32
    %30 = vector.broadcast %cst_19 : f32 to vector<32x16xf32>
    %31 = arith.maximumf %29, %30 : vector<32x16xf32>
    %32 = math.absf %29 : vector<32x16xf32>
    %cst_20 = arith.constant 0.000000e+00 : f32
    %33 = vector.broadcast %cst_20 : f32 to vector<32x16xf32>
    %34 = arith.subf %33, %32 : vector<32x16xf32>
    %35 = math.exp %34 : vector<32x16xf32>
    %36 = math.log1p %35 : vector<32x16xf32>
    %37 = arith.addf %31, %36 : vector<32x16xf32>
    %38 = math.tanh %37 : vector<32x16xf32>
    %39 = arith.mulf %29, %38 : vector<32x16xf32>
    %c48 = arith.constant 48 : index
    %c0_21 = arith.constant 0 : index
    %40 = vector.load %arg1[%c48, %c0_21] : memref<424x64xf32, #tpu.memory_space<vmem>>, vector<16x8xf32>
    %cst_22 = arith.constant dense<0.000000e+00> : vector<32x8xf32>
    %41 = tpu.matmul %39, %40, %cst_22 {dimension_numbers = #tpu.dot_dimension_numbers<[1], [0], [0], [1], [0, 0, 1, 1], [], []>} : vector<32x16xf32>, vector<16x8xf32>, vector<32x8xf32> -> vector<32x8xf32>
    %42 = vector.broadcast %4 : vector<1x8xf32> to vector<32x8xf32>
    %43 = arith.addf %41, %42 : vector<32x8xf32>
    %cst_23 = arith.constant 0.000000e+00 : f32
    %44 = vector.broadcast %cst_23 : f32 to vector<32x8xf32>
    %45 = arith.maximumf %43, %44 : vector<32x8xf32>
    %46 = math.absf %43 : vector<32x8xf32>
    %cst_24 = arith.constant 0.000000e+00 : f32
    %47 = vector.broadcast %cst_24 : f32 to vector<32x8xf32>
    %48 = arith.subf %47, %46 : vector<32x8xf32>
    %49 = math.exp %48 : vector<32x8xf32>
    %50 = math.log1p %49 : vector<32x8xf32>
    %51 = arith.addf %45, %50 : vector<32x8xf32>
    %52 = math.tanh %51 : vector<32x8xf32>
    %53 = arith.mulf %43, %52 : vector<32x8xf32>
    %54 = vector.extract_strided_slice %53 {offsets = [0, 0], sizes = [32, 1], strides = [1, 1]} : vector<32x8xf32> to vector<32x1xf32>
    %c64 = arith.constant 64 : index
    %c0_25 = arith.constant 0 : index
    %55 = vector.load %arg1[%c64, %c0_25] : memref<424x64xf32, #tpu.memory_space<vmem>>, vector<32x16xf32>
    %56 = vector.broadcast %54 : vector<32x1xf32> to vector<32x16xf32>
    %57 = arith.mulf %56, %55 : vector<32x16xf32>
    %58 = vector.extract_strided_slice %53 {offsets = [0, 1], sizes = [32, 1], strides = [1, 1]} : vector<32x8xf32> to vector<32x1xf32>
    %c96 = arith.constant 96 : index
    %c0_26 = arith.constant 0 : index
    %59 = vector.load %arg1[%c96, %c0_26] : memref<424x64xf32, #tpu.memory_space<vmem>>, vector<32x16xf32>
    %60 = vector.broadcast %58 : vector<32x1xf32> to vector<32x16xf32>
    %61 = arith.mulf %60, %59 : vector<32x16xf32>
    %62 = arith.addf %57, %61 : vector<32x16xf32>
    %63 = vector.extract_strided_slice %53 {offsets = [0, 2], sizes = [32, 1], strides = [1, 1]} : vector<32x8xf32> to vector<32x1xf32>
    %c128 = arith.constant 128 : index
    %c0_27 = arith.constant 0 : index
    %64 = vector.load %arg1[%c128, %c0_27] : memref<424x64xf32, #tpu.memory_space<vmem>>, vector<32x16xf32>
    %65 = vector.broadcast %63 : vector<32x1xf32> to vector<32x16xf32>
    %66 = arith.mulf %65, %64 : vector<32x16xf32>
    %67 = arith.addf %62, %66 : vector<32x16xf32>
    %68 = vector.extract_strided_slice %53 {offsets = [0, 3], sizes = [32, 1], strides = [1, 1]} : vector<32x8xf32> to vector<32x1xf32>
    %c160 = arith.constant 160 : index
    %c0_28 = arith.constant 0 : index
    %69 = vector.load %arg1[%c160, %c0_28] : memref<424x64xf32, #tpu.memory_space<vmem>>, vector<32x16xf32>
    %70 = vector.broadcast %68 : vector<32x1xf32> to vector<32x16xf32>
    %71 = arith.mulf %70, %69 : vector<32x16xf32>
    %72 = arith.addf %67, %71 : vector<32x16xf32>
    %73 = vector.extract_strided_slice %53 {offsets = [0, 4], sizes = [32, 1], strides = [1, 1]} : vector<32x8xf32> to vector<32x1xf32>
    %c192 = arith.constant 192 : index
    %c0_29 = arith.constant 0 : index
    %74 = vector.load %arg1[%c192, %c0_29] : memref<424x64xf32, #tpu.memory_space<vmem>>, vector<32x16xf32>
    %75 = vector.broadcast %73 : vector<32x1xf32> to vector<32x16xf32>
    %76 = arith.mulf %75, %74 : vector<32x16xf32>
    %77 = arith.addf %72, %76 : vector<32x16xf32>
    %78 = vector.extract_strided_slice %53 {offsets = [0, 5], sizes = [32, 1], strides = [1, 1]} : vector<32x8xf32> to vector<32x1xf32>
    %c224 = arith.constant 224 : index
    %c0_30 = arith.constant 0 : index
    %79 = vector.load %arg1[%c224, %c0_30] : memref<424x64xf32, #tpu.memory_space<vmem>>, vector<32x16xf32>
    %80 = vector.broadcast %78 : vector<32x1xf32> to vector<32x16xf32>
    %81 = arith.mulf %80, %79 : vector<32x16xf32>
    %82 = arith.addf %77, %81 : vector<32x16xf32>
    %83 = vector.extract_strided_slice %53 {offsets = [0, 6], sizes = [32, 1], strides = [1, 1]} : vector<32x8xf32> to vector<32x1xf32>
    %c256 = arith.constant 256 : index
    %c0_31 = arith.constant 0 : index
    %84 = vector.load %arg1[%c256, %c0_31] : memref<424x64xf32, #tpu.memory_space<vmem>>, vector<32x16xf32>
    %85 = vector.broadcast %83 : vector<32x1xf32> to vector<32x16xf32>
    %86 = arith.mulf %85, %84 : vector<32x16xf32>
    %87 = arith.addf %82, %86 : vector<32x16xf32>
    %88 = vector.extract_strided_slice %53 {offsets = [0, 7], sizes = [32, 1], strides = [1, 1]} : vector<32x8xf32> to vector<32x1xf32>
    %c288 = arith.constant 288 : index
    %c0_32 = arith.constant 0 : index
    %89 = vector.load %arg1[%c288, %c0_32] : memref<424x64xf32, #tpu.memory_space<vmem>>, vector<32x16xf32>
    %90 = vector.broadcast %88 : vector<32x1xf32> to vector<32x16xf32>
    %91 = arith.mulf %90, %89 : vector<32x16xf32>
    %92 = arith.addf %87, %91 : vector<32x16xf32>
    %c320 = arith.constant 320 : index
    %c0_33 = arith.constant 0 : index
    %93 = vector.load %arg1[%c320, %c0_33] : memref<424x64xf32, #tpu.memory_space<vmem>>, vector<2x32xf32>
    %cst_34 = arith.constant dense<0.000000e+00> : vector<2x16xf32>
    %94 = tpu.matmul %93, %92, %cst_34 {dimension_numbers = #tpu.dot_dimension_numbers<[1], [0], [0], [1], [0, 0, 1, 1], [], []>} : vector<2x32xf32>, vector<32x16xf32>, vector<2x16xf32> -> vector<2x16xf32>
    %95 = vector.broadcast %5 : vector<1x16xf32> to vector<2x16xf32>
    %96 = arith.addf %94, %95 : vector<2x16xf32>
    %cst_35 = arith.constant dense<0.000000e+00> : vector<16xf32>
    %97 = vector.multi_reduction <add>, %96, %cst_35 [0] : vector<2x16xf32> to vector<16xf32>
    %98 = vector.shape_cast %97 : vector<16xf32> to vector<1x16xf32>
    %cst_36 = arith.constant 2.000000e+00 : f32
    %99 = vector.broadcast %cst_36 : f32 to vector<1x16xf32>
    %100 = arith.divf %98, %99 : vector<1x16xf32>
    %101 = vector.broadcast %100 : vector<1x16xf32> to vector<2x16xf32>
    %102 = arith.subf %96, %101 : vector<2x16xf32>
    %103 = arith.mulf %102, %102 : vector<2x16xf32>
    %cst_37 = arith.constant dense<0.000000e+00> : vector<16xf32>
    %104 = vector.multi_reduction <add>, %103, %cst_37 [0] : vector<2x16xf32> to vector<16xf32>
    %105 = vector.shape_cast %104 : vector<16xf32> to vector<1x16xf32>
    %cst_38 = arith.constant 2.000000e+00 : f32
    %106 = vector.broadcast %cst_38 : f32 to vector<1x16xf32>
    %107 = arith.divf %105, %106 : vector<1x16xf32>
    %108 = vector.broadcast %100 : vector<1x16xf32> to vector<2x16xf32>
    %109 = arith.subf %96, %108 : vector<2x16xf32>
    %cst_39 = arith.constant 9.99999974E-6 : f32
    %110 = vector.broadcast %cst_39 : f32 to vector<1x16xf32>
    %111 = arith.addf %107, %110 : vector<1x16xf32>
    %112 = math.rsqrt %111 : vector<1x16xf32>
    %113 = vector.broadcast %112 : vector<1x16xf32> to vector<2x16xf32>
    %114 = arith.mulf %109, %113 : vector<2x16xf32>
    %115 = vector.broadcast %6 : vector<1x16xf32> to vector<2x16xf32>
    %116 = arith.mulf %114, %115 : vector<2x16xf32>
    %117 = vector.broadcast %7 : vector<1x16xf32> to vector<2x16xf32>
    %118 = arith.addf %116, %117 : vector<2x16xf32>
    %cst_40 = arith.constant 0.000000e+00 : f32
    %119 = vector.broadcast %cst_40 : f32 to vector<2x16xf32>
    %120 = arith.maximumf %118, %119 : vector<2x16xf32>
    %121 = math.absf %118 : vector<2x16xf32>
    %cst_41 = arith.constant 0.000000e+00 : f32
    %122 = vector.broadcast %cst_41 : f32 to vector<2x16xf32>
    %123 = arith.subf %122, %121 : vector<2x16xf32>
    %124 = math.exp %123 : vector<2x16xf32>
    %125 = math.log1p %124 : vector<2x16xf32>
    %126 = arith.addf %120, %125 : vector<2x16xf32>
    %127 = math.tanh %126 : vector<2x16xf32>
    %128 = arith.mulf %118, %127 : vector<2x16xf32>
    %c328 = arith.constant 328 : index
    %c0_42 = arith.constant 0 : index
    %129 = vector.load %arg1[%c328, %c0_42] : memref<424x64xf32, #tpu.memory_space<vmem>>, vector<16x64xf32>
    %cst_43 = arith.constant dense<0.000000e+00> : vector<2x64xf32>
    %130 = tpu.matmul %128, %129, %cst_43 {dimension_numbers = #tpu.dot_dimension_numbers<[1], [0], [0], [1], [0, 0, 1, 1], [], []>} : vector<2x16xf32>, vector<16x64xf32>, vector<2x64xf32> -> vector<2x64xf32>
    %131 = vector.broadcast %8 : vector<1x64xf32> to vector<2x64xf32>
    %132 = arith.addf %130, %131 : vector<2x64xf32>
    %cst_44 = arith.constant 0.000000e+00 : f32
    %133 = vector.broadcast %cst_44 : f32 to vector<2x64xf32>
    %134 = arith.maximumf %132, %133 : vector<2x64xf32>
    %c344 = arith.constant 344 : index
    %c0_45 = arith.constant 0 : index
    %135 = vector.load %arg1[%c344, %c0_45] : memref<424x64xf32, #tpu.memory_space<vmem>>, vector<16x8xf32>
    %cst_46 = arith.constant dense<0.000000e+00> : vector<2x8xf32>
    %136 = tpu.matmul %128, %135, %cst_46 {dimension_numbers = #tpu.dot_dimension_numbers<[1], [0], [0], [1], [0, 0, 1, 1], [], []>} : vector<2x16xf32>, vector<16x8xf32>, vector<2x8xf32> -> vector<2x8xf32>
    %c360 = arith.constant 360 : index
    %c0_47 = arith.constant 0 : index
    %137 = vector.load %arg1[%c360, %c0_47] : memref<424x64xf32, #tpu.memory_space<vmem>>, vector<64x8xf32>
    %cst_48 = arith.constant dense<0.000000e+00> : vector<2x8xf32>
    %138 = tpu.matmul %134, %137, %cst_48 {dimension_numbers = #tpu.dot_dimension_numbers<[1], [0], [0], [1], [0, 0, 1, 1], [], []>} : vector<2x64xf32>, vector<64x8xf32>, vector<2x8xf32> -> vector<2x8xf32>
    %139 = arith.addf %136, %138 : vector<2x8xf32>
    %140 = vector.broadcast %9 : vector<1x8xf32> to vector<2x8xf32>
    %141 = arith.addf %139, %140 : vector<2x8xf32>
    %c0_49 = arith.constant 0 : index
    %c0_50 = arith.constant 0 : index
    %142 = vector.load %arg3[%c0_49, %c0_50] : memref<2x8xf32, #tpu.memory_space<vmem>>, vector<2x8xf32>
    tpu.vector_store %arg3[%c0_49, %c0_50], %141 {strides = array<i32>} : memref<2x8xf32, #tpu.memory_space<vmem>>, vector<2x8xf32>,
    return
  }
}

</mosaic_0001>

<bundles_post_ra>
// kernel: tpu_custom_call.1
= control target key start
LH: loop header
LB: loop body
LE: loop exit
PB: predicated region body
PF: predicated region fallthrough
CT: control target
= control target key end

     0   :  { %vm31_vm0 = vcmask 261120   ;;  %s2086_s0 = inlined_call_operand.vmem [shape: f32[64,32], index: 0, kind: input, shape index: {}]   ;;  %s2087_s1 = inlined_call_operand.vmem [shape: f32[424,64], index: 1, kind: input, shape index: {}]   ;;  %s2088_s2 = inlined_call_operand.vmem [shape: f32[8,64], index: 2, kind: input, shape index: {}]   ;;  %s2089_s3 = inlined_call_operand.hbm [shape: f32[2,8], index: 3, kind: output, shape index: {}]  }
   0x1   :  { %v22_v0 = vld [vmem:[%s2086_s0 + $0x38] sm:$0xff]  ;;  %v21_v1 = vld [vmem:[%s2086_s0 + $0x30] sm:$0xff]  ;;  %v15_v2 = vld [vmem:[%s2086_s0] sm:$0xff] }
   0x2   :  { %1425 = vmatprep.subr.mxu0 %v22_v0  ;;  %v20_v3 = vld [vmem:[%s2086_s0 + $0x28] sm:$0xff]  ;;  %1433 = vmatprep.mubr.msk.f32.mxu0 %vm31_vm0, %v15_v2 }
   0x3   :  { %1426 = vmatpush3.msra.mxu0 %v22_v0 }
   0x4   :  { %8 = vsyncpa [#allocation3], 0  ;;  %1427 = vmatprep.subr.mxu0 %v21_v1  ;;  %v19_v4 = vld [vmem:[%s2086_s0 + $0x20] sm:$0xff]  ;;  %v1724_v5 = vld [vmem:[%s2086_s0 + $0x8] sm:$0xff]  ;;  %vm135_vm1 = vcmask 130048   ;;  %vm1683_vm14 = vmmov 0  }
   0x5   :  { %1428 = vmatpush3.msra.mxu0 %v21_v1  ;;  %v1729_v6 = vld [vmem:[%s2086_s0 + $0x10] sm:$0xff]  ;;  %v1738_v7 = vld [vmem:[%s2086_s0 + $0x18] sm:$0xff]  ;;  %v130_v8 = vld [vmem:[%s2087_s1 + $0x8] sm:$0xff]  ;;  %vm1032_vm15 = vcmask 123904  }
   0x6   :  { %1429 = vmatprep.subr.mxu0 %v20_v3  ;;  %1439 = vmatprep.subr.mxu1 %v130_v8  ;;  %v129_v9 = vld [vmem:[%s2087_s1] sm:$0xff]  ;;  %v389_v14 = vld [vmem:[%s2087_s1 + $0x28] sm:$0xff] }
   0x7   :  { %1430 = vmatpush3.msra.mxu0 %v20_v3  ;;  %1440 = vmatpush3.msra.mxu1 %v130_v8  ;;  %v388_v15 = vld [vmem:[%s2087_s1 + $0x20] sm:$0xff] }
   0x8   :  { %1431 = vmatprep.subr.mxu0 %v19_v4  ;;  %1441 = vmatprep.subr.mxu1 %v129_v9  ;;  %v1341_v16 = vld [vmem:[%s2088_s2] ss:$0 sm:$0xff] }
   0x9   :  { %1432 = vmatpush3.msra.mxu0 %v19_v4  ;;  %1442 = vmatpush3.msra.mxu1 %v129_v9 }
   0xa   :  { %1434 = vmatmul.mubr.msk.f32.vlgmr.msra.gmra.mxu0 %vm31_vm0, %v1724_v5  ;;  %1463 = vmatprep.subr.mxu0 %v389_v14 }
   0xb   :  { %1436 = vmatprep.mubr.msk.f32.mxu0 %vm31_vm0, %v1729_v6  ;;  %1464 = vmatpush3.msra.mxu0 %v389_v14 }
   0xc   :  { %1465 = vmatprep.subr.mxu0 %v388_v15 }
   0xd   :  { %1466 = vmatpush3.msra.mxu0 %v388_v15 }
   0xe   :  { %1437 = vmatmul.mubr.msk.f32.gmra.mxu0 %vm31_vm0, %v1738_v7 }
  0xca   :  { %v1435_v10 = vpop.f32.mrf.mxu0 }
  0xcc   :  { %v110_v11 = vpop.f32.mrf.mxu0 }
  0xcd   :  { %1443 = vmatprep.mubr.msk.f32.mxu1 %vm135_vm1, %v110_v11 }
  0xce   :  { %v1438_v12 = vpop.f32.mrf.mxu0  ;;  %1444 = vmatmul.mubr.msk.f32.vlgmr.msra.gmra.mxu1 %vm135_vm1, %v1435_v10 }
  0xd0   :  { %v120_v13 = vpop.f32.mrf.mxu0 }
  0xd1   :  { %1446 = vmatprep.mubr.msk.f32.mxu1 %vm135_vm1, %v120_v13 }
  0xd2   :  { %1447 = vmatmul.mubr.msk.f32.gmra.mxu1 %vm135_vm1, %v1438_v12 }
  0xd3   :  { %1457 = vmatprep.mubr.msk.f32.mxu1 %vm31_vm0, %v15_v2 }
 0x18e   :  { %v1445_v17 = vpop.f32.mrf.mxu1 }
 0x18f   :  { %v1762_v18 = vadd.f32 %v1445_v17, %v1341_v16 }
 0x190   :  { %v214_v19 = vpop.f32.mrf.mxu1 }
 0x191   :  { %v238_v20 = vand.u32 2147483647, %v1762_v18  ;;  %v1765_v21 = vadd.f32 %v1341_v16, %v214_v19  ;;  %v234_v2 = vmax.f32 %v1762_v18, 0.0 }
 0x192   :  { %v1448_v22 = vpop.f32.mrf.mxu1 }
 0x193   :  { %v242_v23 = vsub.f32 0.0, %v238_v20  ;;  %v237_v24 = vand.u32 2147483647, %v1765_v21  ;;  %v1768_v25 = vadd.f32 %v1448_v22, %v1341_v16  ;;  %v233_v15 = vmax.f32 %v1765_v21, 0.0 }
 0x194   :  { %v224_v26 = vpop.f32.mrf.mxu1 }
 0x195   :  { %v247_v27 = vmul.f32 1.442695, %v242_v23  ;;  %v241_v28 = vsub.f32 0.0, %v237_v24  ;;  %v240_v29 = vand.u32 2147483647, %v1768_v25  ;;  %v1771_v30 = vadd.f32 %v1341_v16, %v224_v26 }
 0x196   :  { %v236_v4 = vmax.f32 %v1768_v25, 0.0 }
 0x197   :  { %1572 = vpow2.f32 %v247_v27  ;;  %v245_v31 = vmul.f32 1.442695, %v241_v28  ;;  %v244_v32 = vsub.f32 0.0, %v240_v29  ;;  %v239_v33 = vand.u32 2147483647, %v1771_v30 }
 0x198   :  { %v235_v16 = vmax.f32 %v1771_v30, 0.0 }
 0x199   :  { %1574 = vpow2.f32 %v245_v31  ;;  %v251_v34 = vmul.f32 1.442695, %v244_v32  ;;  %v243_v35 = vsub.f32 0.0, %v239_v33  ;;  %v559_v32 = vld [vmem:[%s2087_s1 + $0x30] sm:$0xff]  ;;  %v1350_v33 = vld [vmem:[%s2088_s2 + $0x1] ss:$0 sm:$0xff] }
 0x19b   :  { %1576 = vpow2.f32 %v251_v34  ;;  %v249_v36 = vmul.f32 1.442695, %v243_v35 }
 0x19d   :  { %1578 = vpow2.f32 %v249_v36 }
 0x1a4   :  { %v1573_v37 = vpop.eup %1572 }
 0x1a5   :  { %v262_v38 = vadd.f32 1.0, %v1573_v37  ;;  %v265_v45 = vmul.f32 -0.5, %v1573_v37  ;;  %v268_v51 = vand.u32 2147483647, %v1573_v37 }
 0x1a6   :  { %v1575_v39 = vpop.eup %1574 }
 0x1a7   :  { %1580 = vlog2.f32 %v262_v38  ;;  %v253_v40 = vadd.f32 1.0, %v1575_v39  ;;  %v256_v47 = vmul.f32 -0.5, %v1575_v39  ;;  %v266_v48 = vadd.f32 1.0, %v265_v45 }
 0x1a8   :  { %v1577_v41 = vpop.eup %1576  ;;  %v259_v58 = vand.u32 2147483647, %v1575_v39  ;;  %vm269_vm2 = vcmp.lt.f32.partialorder %v268_v51, 0.0004427343 }
 0x1a9   :  { %1582 = vlog2.f32 %v253_v40  ;;  %v280_v42 = vadd.f32 1.0, %v1577_v41  ;;  %v283_v46 = vmul.f32 -0.5, %v1577_v41  ;;  %v257_v55 = vadd.f32 1.0, %v256_v47 }
 0x1aa   :  { %v1579_v43 = vpop.eup %1578  ;;  %v286_v56 = vand.u32 2147483647, %v1577_v41  ;;  %v267_v57 = vmul.f32 %v1573_v37, %v266_v48  ;;  %vm260_vm4 = vcmp.lt.f32.partialorder %v259_v58, 0.0004427343 }
 0x1ab   :  { %1584 = vlog2.f32 %v280_v42  ;;  %v271_v44 = vadd.f32 1.0, %v1579_v43  ;;  %v274_v49 = vmul.f32 -0.5, %v1579_v43  ;;  %v284_v53 = vadd.f32 1.0, %v283_v46 }
 0x1ac   :  { %v277_v1 = vand.u32 2147483647, %v1579_v43  ;;  %v258_v3 = vmul.f32 %v1575_v39, %v257_v55  ;;  %vm287_vm3 = vcmp.lt.f32.partialorder %v286_v56, 0.0004427343 }
 0x1ad   :  { %1586 = vlog2.f32 %v271_v44  ;;  %v275_v59 = vadd.f32 1.0, %v274_v49  ;;  %v285_v0 = vmul.f32 %v1577_v41, %v284_v53 }
 0x1ae   :  { %vm278_vm5 = vcmp.lt.f32.partialorder %v277_v1, 0.0004427343 }
 0x1af   :  { %v276_v10 = vmul.f32 %v1579_v43, %v275_v59 }
 0x1b4   :  { %v1581_v50 = vpop.eup %1580 }
 0x1b5   :  { %v264_v52 = vmul.f32 0.6931472, %v1581_v50 }
 0x1b6   :  { %v1583_v54 = vpop.eup %1582 }
 0x1b7   :  { %v255_v61 = vmul.f32 0.6931472, %v1583_v54  ;;  %v270_v62 = vsel %vm269_vm2, %v267_v57, %v264_v52  ;;  %vm1321_vm2 = vcmask 58368  }
 0x1b8   :  { %v1585_v60 = vpop.eup %1584  ;;  %v290_v11 = vadd.f32 %v270_v62, %v234_v2 }
 0x1b9   :  { %v282_v63 = vmul.f32 0.6931472, %v1585_v60  ;;  %v261_v12 = vsel %vm260_vm4, %v258_v3, %v255_v61 }
 0x1ba   :  { %v1587_v8 = vpop.eup %1586  ;;  %v289_v19 = vadd.f32 %v261_v12, %v233_v15 }
 0x1bb   :  { %v288_v9 = vsel %vm287_vm3, %v285_v0, %v282_v63  ;;  %v273_v14 = vmul.f32 0.6931472, %v1587_v8 }
 0x1bc   :  { %v292_v13 = vadd.f32 %v288_v9, %v236_v4 }
 0x1bd   :  { %v279_v17 = vsel %vm278_vm5, %v276_v10, %v273_v14 }
 0x1be   :  { %1588 = vtanh.f32 %v292_v13  ;;  %v291_v20 = vadd.f32 %v279_v17, %v235_v16 }
 0x1bf   :  { %1590 = vtanh.f32 %v290_v11 }
 0x1c0   :  { %1592 = vtanh.f32 %v291_v20 }
 0x1c1   :  { %1594 = vtanh.f32 %v289_v19 }
 0x1cb   :  { %v1589_v22 = vpop.eup %1588 }
 0x1cc   :  { %v300_v23 = vmul.f32 %v1589_v22, %v1768_v25  ;;  %v1591_v24 = vpop.eup %1590 }
 0x1cd   :  { %v1593_v26 = vpop.eup %1592  ;;  %v298_v29 = vmul.f32 %v1591_v24, %v1762_v18  ;;  %v387_v18 = vld [vmem:[%s2087_s1 + $0x18] sm:$0xff] }
 0x1ce   :  { %1449 = vmatprep.subr.mxu1 %v300_v23  ;;  %v299_v27 = vmul.f32 %v1593_v26, %v1771_v30  ;;  %v1595_v28 = vpop.eup %1594  ;;  %1467 = vmatprep.subr.mxu0 %v387_v18  ;;  %v560_v30 = vld [vmem:[%s2087_s1 + $0x38] sm:$0xff] }
 0x1cf   :  { %1450 = vmatpush3.msra.mxu1 %v300_v23  ;;  %v297_v31 = vmul.f32 %v1595_v28, %v1765_v21  ;;  %1468 = vmatpush3.msra.mxu0 %v387_v18  ;;  %v386_v21 = vld [vmem:[%s2087_s1 + $0x10] sm:$0xff] }
 0x1d0   :  { %1451 = vmatprep.subr.mxu1 %v299_v27  ;;  %1469 = vmatprep.subr.mxu0 %v386_v21 }
 0x1d1   :  { %1452 = vmatpush3.msra.mxu1 %v299_v27  ;;  %1470 = vmatpush3.msra.mxu0 %v386_v21 }
 0x1d2   :  { %1453 = vmatprep.subr.mxu1 %v298_v29 }
 0x1d3   :  { %1454 = vmatpush3.msra.mxu1 %v298_v29 }
 0x1d4   :  { %1455 = vmatprep.subr.mxu1 %v297_v31 }
 0x1d5   :  { %1456 = vmatpush3.msra.mxu1 %v297_v31 }
 0x1d6   :  { %1458 = vmatmul.mubr.msk.f32.vlgmr.msra.gmra.mxu1 %vm31_vm0, %v1724_v5  ;;  %1477 = vmatprep.subr.mxu1 %v560_v30 }
 0x1d7   :  { %1460 = vmatprep.mubr.msk.f32.mxu1 %vm31_vm0, %v1729_v6  ;;  %1478 = vmatpush3.msra.mxu1 %v560_v30 }
 0x1d8   :  { %1479 = vmatprep.subr.mxu1 %v559_v32 }
 0x1d9   :  { %1480 = vmatpush3.msra.mxu1 %v559_v32 }
 0x1da   :  { %1461 = vmatmul.mubr.msk.f32.gmra.mxu1 %vm31_vm0, %v1738_v7 }
 0x296   :  { %v1459_v25 = vpop.f32.mrf.mxu1 }
 0x298   :  { %v367_v5 = vpop.f32.mrf.mxu1 }
 0x299   :  { %1471 = vmatprep.mubr.msk.f32.mxu0 %vm31_vm0, %v367_v5 }
 0x29a   :  { %v1462_v6 = vpop.f32.mrf.mxu1  ;;  %1472 = vmatmul.mubr.msk.f32.vlgmr.msra.gmra.mxu0 %vm31_vm0, %v1459_v25 }
 0x29c   :  { %v377_v7 = vpop.f32.mrf.mxu1 }
 0x29d   :  { %1474 = vmatprep.mubr.msk.f32.mxu0 %vm31_vm0, %v377_v7 }
 0x29e   :  { %1475 = vmatmul.mubr.msk.f32.gmra.mxu0 %vm31_vm0, %v1462_v6 }
 0x35a   :  { %v1473_v34 = vpop.f32.mrf.mxu0 }
 0x35b   :  { %v1807_v35 = vadd.f32 %v1473_v34, %v1350_v33 }
 0x35c   :  { %v472_v36 = vpop.f32.mrf.mxu0 }
 0x35d   :  { %v496_v37 = vand.u32 2147483647, %v1807_v35  ;;  %v1810_v38 = vadd.f32 %v1350_v33, %v472_v36  ;;  %v492_v15 = vmax.f32 %v1807_v35, 0.0 }
 0x35e   :  { %v1476_v39 = vpop.f32.mrf.mxu0 }
 0x35f   :  { %v500_v40 = vsub.f32 0.0, %v496_v37  ;;  %v495_v41 = vand.u32 2147483647, %v1810_v38  ;;  %v1813_v42 = vadd.f32 %v1476_v39, %v1350_v33  ;;  %v491_v27 = vmax.f32 %v1810_v38, 0.0 }
 0x360   :  { %v482_v43 = vpop.f32.mrf.mxu0 }
 0x361   :  { %v505_v44 = vmul.f32 1.442695, %v500_v40  ;;  %v499_v45 = vsub.f32 0.0, %v495_v41  ;;  %v498_v46 = vand.u32 2147483647, %v1813_v42  ;;  %v1816_v47 = vadd.f32 %v1350_v33, %v482_v43 }
 0x362   :  { %v494_v18 = vmax.f32 %v1813_v42, 0.0 }
 0x363   :  { %1596 = vpow2.f32 %v505_v44  ;;  %v503_v48 = vmul.f32 1.442695, %v499_v45  ;;  %v502_v49 = vsub.f32 0.0, %v498_v46  ;;  %v497_v50 = vand.u32 2147483647, %v1816_v47 }
 0x364   :  { %v493_v30 = vmax.f32 %v1816_v47, 0.0  ;;  %v1674_v45 = vmov 1  }
 0x365   :  { %1598 = vpow2.f32 %v503_v48  ;;  %v509_v51 = vmul.f32 1.442695, %v502_v49  ;;  %v501_v52 = vsub.f32 0.0, %v497_v50  ;;  %1543 = vset.pattern.permute.xlu1 %v1674_v45 }
 0x367   :  { %1600 = vpow2.f32 %v509_v51  ;;  %v507_v53 = vmul.f32 1.442695, %v501_v52 }
 0x369   :  { %1602 = vpow2.f32 %v507_v53 }
 0x370   :  { %v1597_v54 = vpop.eup %1596 }
 0x371   :  { %v520_v55 = vadd.f32 1.0, %v1597_v54  ;;  %v523_v62 = vmul.f32 -0.5, %v1597_v54  ;;  %v526_v2 = vand.u32 2147483647, %v1597_v54 }
 0x372   :  { %v1599_v56 = vpop.eup %1598 }
 0x373   :  { %1604 = vlog2.f32 %v520_v55  ;;  %v511_v57 = vadd.f32 1.0, %v1599_v56  ;;  %v514_v63 = vmul.f32 -0.5, %v1599_v56  ;;  %v524_v1 = vadd.f32 1.0, %v523_v62 }
 0x374   :  { %v1601_v58 = vpop.eup %1600  ;;  %v517_v10 = vand.u32 2147483647, %v1599_v56  ;;  %vm527_vm6 = vcmp.lt.f32.partialorder %v526_v2, 0.0004427343 }
 0x375   :  { %1606 = vlog2.f32 %v511_v57  ;;  %v538_v59 = vadd.f32 1.0, %v1601_v58  ;;  %v541_v0 = vmul.f32 -0.5, %v1601_v58  ;;  %v515_v3 = vadd.f32 1.0, %v514_v63 }
 0x376   :  { %v1603_v60 = vpop.eup %1602  ;;  %v544_v11 = vand.u32 2147483647, %v1601_v58  ;;  %v525_v13 = vmul.f32 %v1597_v54, %v524_v1  ;;  %vm518_vm7 = vcmp.lt.f32.partialorder %v517_v10, 0.0004427343 }
 0x377   :  { %1608 = vlog2.f32 %v538_v59  ;;  %v529_v61 = vadd.f32 1.0, %v1603_v60  ;;  %v532_v4 = vmul.f32 -0.5, %v1603_v60  ;;  %v542_v8 = vadd.f32 1.0, %v541_v0 }
 0x378   :  { %v516_v16 = vmul.f32 %v1599_v56, %v515_v3  ;;  %v535_v23 = vand.u32 2147483647, %v1603_v60  ;;  %vm545_vm8 = vcmp.lt.f32.partialorder %v544_v11, 0.0004427343 }
 0x379   :  { %1610 = vlog2.f32 %v529_v61  ;;  %v533_v17 = vadd.f32 1.0, %v532_v4  ;;  %v543_v22 = vmul.f32 %v1601_v58, %v542_v8 }
 0x37a   :  { %vm536_vm9 = vcmp.lt.f32.partialorder %v535_v23, 0.0004427343 }
 0x37b   :  { %v534_v21 = vmul.f32 %v1603_v60, %v533_v17 }
 0x380   :  { %v1605_v9 = vpop.eup %1604 }
 0x381   :  { %v522_v12 = vmul.f32 0.6931472, %v1605_v9 }
 0x382   :  { %v1607_v14 = vpop.eup %1606 }
 0x383   :  { %v528_v19 = vsel %vm527_vm6, %v525_v13, %v522_v12  ;;  %v513_v20 = vmul.f32 0.6931472, %v1607_v14 }
 0x384   :  { %v1609_v24 = vpop.eup %1608  ;;  %v548_v26 = vadd.f32 %v528_v19, %v492_v15 }
 0x385   :  { %v519_v28 = vsel %vm518_vm7, %v516_v16, %v513_v20  ;;  %v540_v29 = vmul.f32 0.6931472, %v1609_v24 }
 0x386   :  { %v547_v31 = vadd.f32 %v519_v28, %v491_v27  ;;  %v1611_v25 = vpop.eup %1610  ;;  %1612 = vtanh.f32 %v548_v26 }
 0x387   :  { %v546_v5 = vsel %vm545_vm8, %v543_v22, %v540_v29  ;;  %v531_v7 = vmul.f32 0.6931472, %v1611_v25 }
 0x388   :  { %1614 = vtanh.f32 %v547_v31  ;;  %v550_v6 = vadd.f32 %v546_v5, %v494_v18 }
 0x389   :  { %v537_v32 = vsel %vm536_vm9, %v534_v21, %v531_v7 }
 0x38a   :  { %v549_v33 = vadd.f32 %v537_v32, %v493_v30  ;;  %1616 = vtanh.f32 %v550_v6 }
 0x38c   :  { %1618 = vtanh.f32 %v549_v33 }
 0x393   :  { %v1613_v34 = vpop.eup %1612 }
 0x394   :  { %v556_v39 = vmul.f32 %v1613_v34, %v1807_v35  ;;  %v1355_v35 = vld [vmem:[%s2088_s2 + $0x2] ss:$0 sm:$0xff] }
 0x395   :  { %v1615_v36 = vpop.eup %1614 }
 0x396   :  { %v555_v37 = vmul.f32 %v1615_v36, %v1810_v38  ;;  %v1675_v38 = vmov 0  }
 0x397   :  { %v1617_v40 = vpop.eup %1616  ;;  %1542 = vset.pattern.permute.xlu0 %v1675_v38 }
 0x398   :  { %1481 = vmatprep.mubr.msk.f32.mxu1 %vm135_vm1, %v555_v37  ;;  %v558_v44 = vmul.f32 %v1617_v40, %v1813_v42  ;;  %v1676_v40 = vmov 3  }
 0x399   :  { %1482 = vmatmul.mubr.msk.f32.vlgmr.msra.gmra.mxu1 %vm135_vm1, %v556_v39  ;;  %v1619_v41 = vpop.eup %1618 }
 0x39a   :  { %v557_v43 = vmul.f32 %v1619_v41, %v1816_v47  ;;  %v1677_v41 = vmov 2  }
 0x39c   :  { %1484 = vmatprep.mubr.msk.f32.mxu1 %vm135_vm1, %v557_v43  ;;  %v1678_v43 = vmov 5  }
 0x39d   :  { %1485 = vmatmul.mubr.msk.f32.gmra.mxu1 %vm135_vm1, %v558_v44  ;;  %v1679_v44 = vmov 4  }
 0x459   :  { %v1483_v46 = vpop.f32.mrf.mxu1 }
 0x45a   :  { %v649_v48 = vadd.f32 %v1483_v46, %v1355_v35 }
 0x45b   :  { %v643_v49 = vpop.f32.mrf.mxu1 }
 0x45c   :  { %v667_v47 = vand.u32 2147483647, %v649_v48  ;;  %v1836_v50 = vadd.f32 %v1355_v35, %v643_v49  ;;  %v663_v16 = vmax.f32 %v649_v48, 0.0 }
 0x45d   :  { %v1486_v52 = vpop.f32.mrf.mxu1 }
 0x45e   :  { %v671_v42 = vsub.f32 0.0, %v667_v47  ;;  %v666_v51 = vand.u32 2147483647, %v1836_v50  ;;  %v1839_v53 = vadd.f32 %v1486_v52, %v1355_v35  ;;  %v662_v31 = vmax.f32 %v1836_v50, 0.0 }
 0x45f   :  { %v653_v60 = vpop.f32.mrf.mxu1 }
 0x460   :  { %v676_v54 = vmul.f32 1.442695, %v671_v42  ;;  %v670_v55 = vsub.f32 0.0, %v666_v51  ;;  %v669_v56 = vand.u32 2147483647, %v1839_v53  ;;  %v1842_v63 = vadd.f32 %v1355_v35, %v653_v60 }
 0x461   :  { %v665_v37 = vmax.f32 %v1839_v53, 0.0  ;;  %v1680_v42 = vmov 6   ;;  %v1681_v60 = vmov 7  }
 0x462   :  { %1620 = vpow2.f32 %v676_v54  ;;  %v674_v57 = vmul.f32 1.442695, %v670_v55  ;;  %v673_v58 = vsub.f32 0.0, %v669_v56  ;;  %v668_v2 = vand.u32 2147483647, %v1842_v63 }
 0x463   :  { %v664_v56 = vmax.f32 %v1842_v63, 0.0 }
 0x464   :  { %1622 = vpow2.f32 %v674_v57  ;;  %v680_v59 = vmul.f32 1.442695, %v673_v58  ;;  %v672_v4 = vsub.f32 0.0, %v668_v2  ;;  %v787_v2 = vld [vmem:[%s2087_s1 + $0x88] sm:$0xff] }
 0x466   :  { %1624 = vpow2.f32 %v680_v59  ;;  %v678_v10 = vmul.f32 1.442695, %v672_v4 }
 0x46f   :  { %v1621_v61 = vpop.eup %1620 }
 0x470   :  { %v691_v62 = vadd.f32 1.0, %v1621_v61  ;;  %v694_v3 = vmul.f32 -0.5, %v1621_v61  ;;  %v697_v11 = vand.u32 2147483647, %v1621_v61 }
 0x471   :  { %v1623_v0 = vpop.eup %1622 }
 0x472   :  { %1626 = vlog2.f32 %v691_v62  ;;  %v682_v1 = vadd.f32 1.0, %v1623_v0  ;;  %v695_v9 = vadd.f32 1.0, %v694_v3  ;;  %vm698_vm10 = vcmp.lt.f32.partialorder %v697_v11, 0.0004427343  ;;  %v815_v3 = vld [vmem:[%s2087_s1 + $0xa8] sm:$0xff] }
 0x473   :  { %v1625_v8 = vpop.eup %1624  ;;  %v685_v17 = vmul.f32 -0.5, %v1623_v0  ;;  %v688_v24 = vand.u32 2147483647, %v1623_v0 }
 0x474   :  { %1628 = vlog2.f32 %v682_v1  ;;  %v709_v12 = vadd.f32 1.0, %v1625_v8  ;;  %v696_v15 = vmul.f32 %v1621_v61, %v695_v9  ;;  %v712_v29 = vmul.f32 -0.5, %v1625_v8 }
 0x475   :  { %1630 = vpow2.f32 %v678_v10  ;;  %v686_v23 = vadd.f32 1.0, %v685_v17  ;;  %vm689_vm11 = vcmp.lt.f32.partialorder %v688_v24, 0.0004427343  ;;  %v715_v6 = vand.u32 2147483647, %v1625_v8 }
 0x476   :  { %1632 = vlog2.f32 %v709_v12  ;;  %v713_v5 = vadd.f32 1.0, %v712_v29  ;;  %v1682_v61 = vmov 0.0  }
 0x477   :  { %v687_v27 = vmul.f32 %v1623_v0, %v686_v23  ;;  %vm716_vm12 = vcmp.lt.f32.partialorder %v715_v6, 0.0004427343  ;;  %1487 = vmatprep.subr.mxu0 %v1682_v61  ;;  %1505 = vmatprep.subr.mxu1 %v1682_v61  ;;  %v899_v23 = vld [vmem:[%s2087_s1 + $0x108] sm:$0xff]  ;;  %v761_v6 = vld [vmem:[%s2087_s1 + $0x78] sm:$0xff] }
 0x478   :  { %v714_v34 = vmul.f32 %v1625_v8, %v713_v5  ;;  %1495 = vmatprep.mubr.msk.f32.mxu0 %vm1683_vm14, %v1682_v61  ;;  %1521 = vmatprep.mubr.msk.f32.mxu1 %vm1683_vm14, %v1682_v61 }
 0x47f   :  { %v1627_v13 = vpop.eup %1626 }
 0x480   :  { %v693_v14 = vmul.f32 0.6931472, %v1627_v13  ;;  %v843_v13 = vld [vmem:[%s2087_s1 + $0xc8] sm:$0xff] }
 0x481   :  { %v1629_v22 = vpop.eup %1628 }
 0x482   :  { %v699_v19 = vsel %vm698_vm10, %v696_v15, %v693_v14  ;;  %v684_v26 = vmul.f32 0.6931472, %v1629_v22  ;;  %v1631_v18 = vpop.eup %1630  ;;  %v871_v14 = vld [vmem:[%s2087_s1 + $0xe8] sm:$0xff] }
 0x483   :  { %v719_v20 = vadd.f32 %v699_v19, %v663_v16  ;;  %v1633_v21 = vpop.eup %1632  ;;  %v700_v30 = vadd.f32 1.0, %v1631_v18  ;;  %v703_v46 = vmul.f32 -0.5, %v1631_v18  ;;  %v706_v51 = vand.u32 2147483647, %v1631_v18 }
 0x484   :  { %v690_v28 = vsel %vm689_vm11, %v687_v27, %v684_v26  ;;  %v711_v7 = vmul.f32 0.6931472, %v1633_v21 }
 0x485   :  { %1634 = vtanh.f32 %v719_v20  ;;  %v718_v25 = vadd.f32 %v690_v28, %v662_v31  ;;  %v704_v47 = vadd.f32 1.0, %v703_v46  ;;  %vm707_vm13 = vcmp.lt.f32.partialorder %v706_v51, 0.0004427343  ;;  %v901_v51 = vld [vmem:[%s2087_s1 + $0x118] sm:$0xff] }
 0x486   :  { %v717_v36 = vsel %vm716_vm12, %v714_v34, %v711_v7  ;;  %v789_v34 = vld [vmem:[%s2087_s1 + $0x98] sm:$0xff] }
 0x487   :  { %1636 = vtanh.f32 %v718_v25  ;;  %v721_v39 = vadd.f32 %v717_v36, %v665_v37  ;;  %v705_v54 = vmul.f32 %v1631_v18, %v704_v47 }
 0x488   :  { %1638 = vlog2.f32 %v700_v30 }
 0x489   :  { %1640 = vtanh.f32 %v721_v39 }
 0x492   :  { %v1635_v32 = vpop.eup %1634 }
 0x493   :  { %v1846_v33 = vmul.f32 %v1635_v32, %v649_v48  ;;  %v733_v32 = vld [vmem:[%s2087_s1 + $0x58] sm:$0xff] }
 0x494   :  { %v1637_v35 = vpop.eup %1636 }
 0x495   :  { %767 = vperm.xlu1 %1543, %v1846_v33   ;;  %741 = vperm.xlu0 %1542, %v1846_v33   ;;  %v1639_v48 = vpop.eup %1638  ;;  %v1859_v49 = vmul.f32 %v1637_v35, %v1836_v50  ;;  %v845_v35 = vld [vmem:[%s2087_s1 + $0xd8] sm:$0xff] }
 0x496   :  { %v702_v52 = vmul.f32 0.6931472, %v1639_v48  ;;  %v1641_v55 = vpop.eup %1640 }
 0x497   :  { %v729_v57 = vmul.f32 %v1641_v55, %v1839_v53 }
 0x498   :  { %v708_v50 = vsel %vm707_vm13, %v705_v54, %v702_v52 }
 0x499   :  { %1545 = vset.pattern.permute.xlu1 %v1676_v40  ;;  %1544 = vset.pattern.permute.xlu0 %v1677_v41  ;;  %v720_v58 = vadd.f32 %v708_v50, %v664_v56 }
 0x49a   :  { %823 = vperm.xlu1 %1545, %v1846_v33   ;;  %795 = vperm.xlu0 %1544, %v1846_v33  }
 0x49b   :  { %1642 = vtanh.f32 %v720_v58  ;;  %v929_v58 = vld [vmem:[%s2087_s1 + $0x138] sm:$0xff] }
 0x49e   :  { %1547 = vset.pattern.permute.xlu1 %v1678_v43  ;;  %1546 = vset.pattern.permute.xlu0 %v1679_v44 }
 0x49f   :  { %879 = vperm.xlu1 %1547, %v1846_v33   ;;  %851 = vperm.xlu0 %1546, %v1846_v33  }
 0x4a3   :  { %1548 = vset.pattern.permute.xlu1 %v1680_v42  ;;  %1551 = vset.pattern.permute.xlu0 %v1677_v41 }
 0x4a4   :  { %907 = vperm.xlu1 %1548, %v1846_v33   ;;  %791 = vperm.xlu0 %1551, %v1859_v49  }
 0x4a8   :  { %1549 = vset.pattern.permute.xlu1 %v1675_v38  ;;  %1554 = vset.pattern.permute.xlu0 %v1678_v43  ;;  %v1643_v53 = vpop.eup %1642 }
 0x4a9   :  { %875 = vperm.xlu0 %1554, %v1859_v49   ;;  %736 = vperm.xlu1 %1549, %v1859_v49   ;;  %v728_v59 = vmul.f32 %v1643_v53, %v1842_v63 }
 0x4ad   :  { %1555 = vset.pattern.permute.xlu0 %v1675_v38  ;;  %1550 = vset.pattern.permute.xlu1 %v1674_v45 }
 0x4ae   :  { %763 = vperm.xlu1 %1550, %v1859_v49   ;;  %751 = vperm.xlu0 %1555, %v729_v57  }
 0x4b2   :  { %1552 = vset.pattern.permute.xlu1 %v1676_v40  ;;  %1556 = vset.pattern.permute.xlu0 %v1674_v45 }
 0x4b3   :  { %819 = vperm.xlu1 %1552, %v1859_v49   ;;  %775 = vperm.xlu0 %1556, %v729_v57  }
 0x4b7   :  { %1553 = vset.pattern.permute.xlu1 %v1679_v44  ;;  %1558 = vset.pattern.permute.xlu0 %v1676_v40 }
 0x4b8   :  { %847 = vperm.xlu1 %1553, %v1859_v49   ;;  %831 = vperm.xlu0 %1558, %v729_v57  }
 0x4bc   :  { %1557 = vset.pattern.permute.xlu1 %v1677_v41  ;;  %1561 = vset.pattern.permute.xlu0 %v1680_v42 }
 0x4bd   :  { %803 = vperm.xlu1 %1557, %v729_v57   ;;  %915 = vperm.xlu0 %1561, %v729_v57  }
 0x4c1   :  { %1559 = vset.pattern.permute.xlu1 %v1679_v44  ;;  %1567 = vset.pattern.permute.xlu0 %v1679_v44 }
 0x4c2   :  { %859 = vperm.xlu1 %1559, %v729_v57   ;;  %855 = vperm.xlu0 %1567, %v728_v59  }
 0x4c6   :  { %1560 = vset.pattern.permute.xlu1 %v1678_v43  ;;  %1569 = vset.pattern.permute.xlu0 %v1680_v42  ;;  %v873_v42 = vld [vmem:[%s2087_s1 + $0xf8] sm:$0xff] }
 0x4c7   :  { %887 = vperm.xlu1 %1560, %v729_v57   ;;  %911 = vperm.xlu0 %1569, %v728_v59  }
 0x4cb   :  { %1562 = vset.pattern.permute.xlu1 %v1681_v60  ;;  %903 = vperm.xlu0 %1569, %v1859_v49  }
 0x4cc   :  { %943 = vperm.xlu1 %1562, %v729_v57  }
 0x4cf   :  { %1571 = vset.pattern.permute.xlu0 %v1681_v60 }
 0x4d0   :  { %1563 = vset.pattern.permute.xlu1 %v1675_v38  ;;  %v731_v38 = vld [vmem:[%s2087_s1 + $0x48] sm:$0xff] }
 0x4d1   :  { %746 = vperm.xlu1 %1563, %v728_v59  }
 0x4d5   :  { %1564 = vset.pattern.permute.xlu1 %v1674_v45  ;;  %v759_v45 = vld [vmem:[%s2087_s1 + $0x68] sm:$0xff] }
 0x4d6   :  { %771 = vperm.xlu1 %1564, %v728_v59  }
 0x4da   :  { %1565 = vset.pattern.permute.xlu1 %v1677_v41  ;;  %v817_v41 = vld [vmem:[%s2087_s1 + $0xb8] sm:$0xff] }
 0x4db   :  { %799 = vperm.xlu1 %1565, %v728_v59  }
 0x4df   :  { %1566 = vset.pattern.permute.xlu1 %v1676_v40 }
 0x4e0   :  { %827 = vperm.xlu1 %1566, %v728_v59  }
 0x4e4   :  { %1568 = vset.pattern.permute.xlu1 %v1678_v43 }
 0x4e5   :  { %883 = vperm.xlu1 %1568, %v728_v59  }
 0x4e9   :  { %1570 = vset.pattern.permute.xlu1 %v1681_v60 }
 0x4ea   :  { %935 = vperm.xlu1 %1570, %v1846_v33  }
 0x4ee   :  { %939 = vperm.xlu1 %1570, %v728_v59  }
 0x4f2   :  { %931 = vperm.xlu1 %1570, %v1859_v49  }
 0x510   :  { %v768_v62 = vpop.permute.xlu1 %767  ;;  %v742_v63 = vpop.permute.xlu0 %741 }
 0x511   :  { %v779_v0 = vmul.f32 %v768_v62, %v759_v45  ;;  %v755_v1 = vmul.f32 %v742_v63, %v731_v38  ;;  %v760_v63 = vld [vmem:[%s2087_s1 + $0x70] sm:$0xff] }
 0x513   :  { %v783_v9 = vadd.f32 %v779_v0, %v755_v1  ;;  %v732_v0 = vld [vmem:[%s2087_s1 + $0x50] sm:$0xff] }
 0x514   :  { %v788_v1 = vld [vmem:[%s2087_s1 + $0x90] sm:$0xff] }
 0x515   :  { %v824_v4 = vpop.permute.xlu1 %823  ;;  %v796_v8 = vpop.permute.xlu0 %795 }
 0x516   :  { %v807_v10 = vmul.f32 %v796_v8, %v787_v2  ;;  %v835_v11 = vmul.f32 %v824_v4, %v815_v3  ;;  %v758_v4 = vld [vmem:[%s2087_s1 + $0x60] sm:$0xff] }
 0x518   :  { %v811_v12 = vadd.f32 %v807_v10, %v783_v9  ;;  %v730_v10 = vld [vmem:[%s2087_s1 + $0x40] sm:$0xff] }
 0x51a   :  { %v880_v15 = vpop.permute.xlu1 %879  ;;  %v839_v16 = vadd.f32 %v835_v11, %v811_v12  ;;  %v852_v17 = vpop.permute.xlu0 %851  ;;  %v816_v11 = vld [vmem:[%s2087_s1 + $0xb0] sm:$0xff] }
 0x51b   :  { %v863_v19 = vmul.f32 %v852_v17, %v843_v13  ;;  %v891_v20 = vmul.f32 %v880_v15, %v871_v14 }
 0x51d   :  { %v867_v22 = vadd.f32 %v863_v19, %v839_v16 }
 0x51f   :  { %v908_v24 = vpop.permute.xlu1 %907  ;;  %v895_v26 = vadd.f32 %v891_v20, %v867_v22  ;;  %v1916_v28 = vpop.permute.xlu0 %791  ;;  %v786_v20 = vld [vmem:[%s2087_s1 + $0x80] sm:$0xff]  ;;  %v844_v22 = vld [vmem:[%s2087_s1 + $0xd0] sm:$0xff] }
 0x520   :  { %v919_v27 = vmul.f32 %v908_v24, %v899_v23 }
 0x522   :  { %v1918_v29 = vadd.f32 %v919_v27, %v895_v26  ;;  %v814_v26 = vld [vmem:[%s2087_s1 + $0xa0] sm:$0xff]  ;;  %v872_v27 = vld [vmem:[%s2087_s1 + $0xf0] sm:$0xff] }
 0x524   :  { %v737_v31 = vpop.permute.xlu1 %736  ;;  %v1920_v18 = vpop.permute.xlu0 %875 }
 0x525   :  { %v754_v16 = vmul.f32 %v737_v31, %v730_v10  ;;  %v806_v31 = vmul.f32 %v1916_v28, %v786_v20  ;;  %v870_v28 = vld [vmem:[%s2087_s1 + $0xe0] sm:$0xff] }
 0x529   :  { %v764_v21 = vpop.permute.xlu1 %763  ;;  %v752_v25 = vpop.permute.xlu0 %751 }
 0x52a   :  { %v757_v36 = vmul.f32 %v752_v25, %v733_v32  ;;  %v778_v12 = vmul.f32 %v764_v21, %v758_v4 }
 0x52c   :  { %v782_v23 = vadd.f32 %v778_v12, %v754_v16 }
 0x52e   :  { %v1922_v5 = vpop.permute.xlu1 %819  ;;  %v776_v7 = vpop.permute.xlu0 %775  ;;  %v810_v32 = vadd.f32 %v806_v31, %v782_v23 }
 0x52f   :  { %v781_v33 = vmul.f32 %v776_v7, %v761_v6  ;;  %v842_v6 = vld [vmem:[%s2087_s1 + $0xc0] sm:$0xff] }
 0x531   :  { %v785_v39 = vadd.f32 %v781_v33, %v757_v36  ;;  %v834_v33 = vmul.f32 %v1922_v5, %v814_v26 }
 0x533   :  { %v1927_v30 = vpop.permute.xlu1 %847  ;;  %v832_v43 = vpop.permute.xlu0 %831 }
 0x534   :  { %v837_v46 = vmul.f32 %v832_v43, %v817_v41  ;;  %v838_v41 = vadd.f32 %v834_v33, %v810_v32  ;;  %v1363_v33 = vld [vmem:[%s2088_s2 + $0x5] ss:$0 sm:$0xff] }
 0x538   :  { %v804_v37 = vpop.permute.xlu1 %803  ;;  %v916_v52 = vpop.permute.xlu0 %915 }
 0x539   :  { %v809_v40 = vmul.f32 %v804_v37, %v789_v34  ;;  %v921_v56 = vmul.f32 %v916_v52, %v901_v51  ;;  %v862_v37 = vmul.f32 %v1927_v30, %v842_v6  ;;  %v927_v30 = vld [vmem:[%s2087_s1 + $0x128] sm:$0xff] }
 0x53b   :  { %v813_v44 = vadd.f32 %v809_v40, %v785_v39  ;;  %v900_v39 = vld [vmem:[%s2087_s1 + $0x110] sm:$0xff] }
 0x53d   :  { %v860_v48 = vpop.permute.xlu1 %859  ;;  %v841_v49 = vadd.f32 %v837_v46, %v813_v44  ;;  %v856_v14 = vpop.permute.xlu0 %855  ;;  %v898_v44 = vld [vmem:[%s2087_s1 + $0x100] sm:$0xff]  ;;  %v866_v46 = vadd.f32 %v862_v37, %v838_v41 }
 0x53e   :  { %v865_v47 = vmul.f32 %v860_v48, %v845_v35  ;;  %v864_v21 = vmul.f32 %v856_v14, %v844_v22  ;;  %v928_v35 = vld [vmem:[%s2087_s1 + $0x130] sm:$0xff] }
 0x540   :  { %v869_v55 = vadd.f32 %v865_v47, %v841_v49  ;;  %v890_v49 = vmul.f32 %v1920_v18, %v870_v28 }
 0x542   :  { %v888_v54 = vpop.permute.xlu1 %887  ;;  %v912_v7 = vpop.permute.xlu0 %911 }
 0x543   :  { %v893_v50 = vmul.f32 %v888_v54, %v873_v42  ;;  %v920_v48 = vmul.f32 %v912_v7, %v900_v39  ;;  %v1362_v7 = vld [vmem:[%s2088_s2 + $0x4] ss:$0 sm:$0xff] }
 0x545   :  { %v897_v57 = vadd.f32 %v893_v50, %v869_v55  ;;  %v926_v55 = vld [vmem:[%s2087_s1 + $0x120] sm:$0xff]  ;;  %v894_v50 = vadd.f32 %v890_v49, %v866_v46 }
 0x546   :  { %v904_v5 = vpop.permute.xlu0 %903 }
 0x547   :  { %v944_v53 = vpop.permute.xlu1 %943  ;;  %v925_v59 = vadd.f32 %v921_v56, %v897_v57  ;;  %v918_v42 = vmul.f32 %v904_v5, %v898_v44 }
 0x548   :  { %v949_v60 = vmul.f32 %v944_v53, %v929_v58 }
 0x549   :  { %v922_v58 = vadd.f32 %v918_v42, %v894_v50  ;;  %v1165_v50 = vld [vmem:[%s2087_s1 + $0x170] sm:$0xff] }
 0x54a   :  { %v953_v45 = vadd.f32 %v949_v60, %v925_v59  ;;  %v954_v60 = vld [vmem:[%s2087_s1 + $0x140] sm:$0x3] }
 0x54c   :  { %1488 = vmatpush3.msra.mxu0 %v953_v45  ;;  %v747_v38 = vpop.permute.xlu1 %746  ;;  %v1082_v45 = vld [vmem:[%s2087_s1 + $0x148] sm:$0xff] }
 0x54d   :  { %1489 = vmatprep.subr.mxu0 %v1682_v61  ;;  %v756_v8 = vmul.f32 %v747_v38, %v732_v0  ;;  %v1171_v38 = vld [vmem:[%s2087_s1 + $0x1a0] sm:$0xff]  ;;  %v1168_v0 = vld [vmem:[%s2087_s1 + $0x188] sm:$0xff] }
 0x54e   :  { %1506 = vmatpush3.msra.mxu1 %v1171_v38 }
 0x54f   :  { %1507 = vmatprep.subr.mxu1 %v1682_v61 }
 0x551   :  { %v772_v62 = vpop.permute.xlu1 %771 }
 0x552   :  { %v780_v2 = vmul.f32 %v772_v62, %v760_v63  ;;  %v1170_v62 = vld [vmem:[%s2087_s1 + $0x198] sm:$0xff]  ;;  %v1169_v63 = vld [vmem:[%s2087_s1 + $0x190] sm:$0xff] }
 0x553   :  { %1508 = vmatpush3.msra.mxu1 %v1170_v62 }
 0x554   :  { %v784_v13 = vadd.f32 %v780_v2, %v756_v8  ;;  %1509 = vmatprep.subr.mxu1 %v1682_v61  ;;  %v1167_v2 = vld [vmem:[%s2087_s1 + $0x180] sm:$0xff] }
 0x555   :  { %1510 = vmatpush3.msra.mxu1 %v1169_v63 }
 0x556   :  { %v800_v3 = vpop.permute.xlu1 %799  ;;  %1511 = vmatprep.subr.mxu1 %v1682_v61 }
 0x557   :  { %v808_v9 = vmul.f32 %v800_v3, %v788_v1  ;;  %v1360_v1 = vld [vmem:[%s2088_s2 + $0x3] ss:$0 sm:$0xff]  ;;  %1512 = vmatpush3.msra.mxu1 %v1168_v0 }
 0x558   :  { %1513 = vmatprep.subr.mxu1 %v1682_v61 }
 0x559   :  { %v812_v17 = vadd.f32 %v808_v9, %v784_v13  ;;  %1514 = vmatpush3.msra.mxu1 %v1167_v2 }
 0x55a   :  { %1515 = vmatprep.subr.mxu1 %v1682_v61 }
 0x55b   :  { %v828_v15 = vpop.permute.xlu1 %827 }
 0x55c   :  { %v836_v19 = vmul.f32 %v828_v15, %v816_v11 }
 0x55e   :  { %v840_v24 = vadd.f32 %v836_v19, %v812_v17 }
 0x560   :  { %v884_v25 = vpop.permute.xlu1 %883  ;;  %v868_v34 = vadd.f32 %v864_v21, %v840_v24 }
 0x561   :  { %v892_v36 = vmul.f32 %v884_v25, %v872_v27 }
 0x563   :  { %v896_v43 = vadd.f32 %v892_v36, %v868_v34 }
 0x565   :  { %v936_v40 = vpop.permute.xlu1 %935  ;;  %v924_v52 = vadd.f32 %v920_v48, %v896_v43 }
 0x566   :  { %v947_v51 = vmul.f32 %v936_v40, %v927_v30 }
 0x568   :  { %v951_v53 = vadd.f32 %v947_v51, %v1918_v29  ;;  %v1083_v29 = vld [vmem:[%s2087_s1 + $0x150] sm:$0xff] }
 0x569   :  { %v940_v47 = vpop.permute.xlu1 %939 }
 0x56a   :  { %v948_v54 = vmul.f32 %v940_v47, %v928_v35 }
 0x56c   :  { %v952_v56 = vadd.f32 %v948_v54, %v924_v52  ;;  %v1163_v52 = vld [vmem:[%s2087_s1 + $0x160] sm:$0xff]  ;;  %v1162_v54 = vld [vmem:[%s2087_s1 + $0x158] sm:$0xff] }
 0x56d   :  { %v932_v57 = vpop.permute.xlu1 %931 }
 0x56e   :  { %v946_v59 = vmul.f32 %v932_v57, %v926_v55  ;;  %1490 = vmatpush3.msra.mxu0 %v952_v56  ;;  %v1166_v55 = vld [vmem:[%s2087_s1 + $0x178] sm:$0xff]  ;;  %v1164_v56 = vld [vmem:[%s2087_s1 + $0x168] sm:$0xff]  ;;  %v1364_v57 = vld [vmem:[%s2088_s2 + $0x6] ss:$0 sm:$0xff]  ;;  %s1684_s1 = smov [#allocation2]  }
 0x56f   :  { %1491 = vmatprep.subr.mxu0 %v1682_v61  ;;  %1516 = vmatpush3.msra.mxu1 %v1166_v55  ;;  %s1329_s10 = sshll.u32 %s1684_s1, 4  ;;  %s1330_s10 = int_to_ptr.vmem [resolvable:$true] %s1329_s10 }
 0x570   :  { %v950_v18 = vadd.f32 %v946_v59, %v922_v58  ;;  %1492 = vmatpush3.msra.mxu0 %v951_v53  ;;  %1517 = vmatprep.subr.mxu1 %v1682_v61  ;;  %s1652_s11 = scalar_lea.vmem %s1330_s10, 32  ;;  %p1657_p1 = scmp.lt.s32.totalorder %s1330_s10, %s1330_s10 }
 0x571   :  { %1493 = vmatprep.subr.mxu0 %v1682_v61  ;;  %1518 = vmatpush3.msra.mxu1 %v1165_v50  ;;  %p1653_p0 = scmp.ne.s32.totalorder %s1330_s10, %s1652_s11  ;;  %p1658_p2 = scmp.lt.s32.totalorder %s1652_s11, %s1652_s11 }
 0x572   :  { %1494 = vmatpush3.msra.mxu0 %v950_v18  ;;  %1519 = vmatprep.subr.mxu1 %v1682_v61 }
 0x573   :  { %1496 = vmatmul.mubr.msk.f32.vlgmr.msra.gmra.mxu0 %vm31_vm0, %v954_v60  ;;  %1498 = vmatprep.subr.mxu0 %v1682_v61  ;;  %p1659_p3 = por %p1658_p2, %p1657_p1 }
 0x574   :  { %1502 = vmatprep.mubr.msk.f32.mxu0 %vm1683_vm14, %v1682_v61  ;;  %1499 = vmatpush3.msra.mxu0 %v1083_v29 }
 0x575   :  { %1500 = vmatprep.subr.mxu0 %v1682_v61  ;;  %1520 = vmatpush3.msra.mxu1 %v1164_v56  ;;  %p1660_p4 = pnand %p1659_p3, %p1653_p0 }
 0x576   :  { %1501 = vmatpush3.msra.mxu0 %v1082_v45  ;;  %v1368_v45 = vld [vmem:[%s2088_s2 + $0x7] ss:$0 sm:$0xff] }
 0x577   :  { %1524 = vmatprep.subr.mxu0 %v1682_v61 }
 0x633   :  { %v1028_v3 = vpop.f32.mrf.mxu0 }
 0x634   :  { %v1029_v4 = vadd.f32 %v1360_v1, %v1028_v3 }
 0x635   :  { %v1497_v8 = vpop.f32.mrf.mxu0 }
 0x636   :  { %v1033_v9 = vsel %vm1032_vm15, %v1029_v4, 0.0 }
 0x637   :  { %v1034_v10 = vrot.slane %v1033_v9, 4 }
 0x639   :  { %v1035_v11 = vadd.f32 %v1034_v10, %v1033_v9 }
 0x63b   :  { %v1036_v12 = vrot.slane %v1035_v11, 2 }
 0x63d   :  { %v1037_v13 = vadd.f32 %v1036_v12, %v1035_v11 }
 0x63f   :  { %v1038_v14 = vrot.slane %v1037_v13, 1 }
 0x641   :  { %v1039_v15 = vadd.f32 %v1038_v14, %v1037_v13 }
 0x643   :  { %v1041_v16 = vmul.f32 0.5, %v1039_v15 }
 0x645   :  { %v1042_v17 = vsub.f32 %v1029_v4, %v1041_v16 }
 0x647   :  { %v1043_v19 = vmul.f32 %v1042_v17, %v1042_v17 }
 0x649   :  { %v1044_v20 = vsel %vm1032_vm15, %v1043_v19, 0.0 }
 0x64a   :  { %v1045_v22 = vrot.slane %v1044_v20, 4 }
 0x64c   :  { %v1046_v23 = vadd.f32 %v1045_v22, %v1044_v20 }
 0x64e   :  { %v1047_v24 = vrot.slane %v1046_v23, 2 }
 0x650   :  { %v1048_v26 = vadd.f32 %v1047_v24, %v1046_v23 }
 0x652   :  { %v1049_v27 = vrot.slane %v1048_v26, 1 }
 0x654   :  { %v1050_v31 = vadd.f32 %v1049_v27, %v1048_v26 }
 0x656   :  { %v1051_v21 = vmul.f32 0.5, %v1050_v31 }
 0x658   :  { %v1052_v25 = vadd.f32 1e-05, %v1051_v21 }
 0x65a   :  { %1644 = vrsqrt.f32 %v1052_v25 }
 0x667   :  { %v1645_v6 = vpop.eup %1644 }
 0x668   :  { %v1054_v32 = vmul.f32 %v1645_v6, %v1042_v17 }
 0x66a   :  { %v1059_v34 = vmul.f32 %v1362_v7, %v1054_v32 }
 0x66c   :  { %v1064_v36 = vadd.f32 %v1363_v33, %v1059_v34 }
 0x66e   :  { %v1066_v37 = vand.u32 2147483647, %v1064_v36  ;;  %v1065_v48 = vmax.f32 %v1064_v36, 0.0 }
 0x670   :  { %v1067_v39 = vsub.f32 0.0, %v1066_v37 }
 0x672   :  { %v1068_v40 = vmul.f32 1.442695, %v1067_v39 }
 0x674   :  { %1646 = vpow2.f32 %v1068_v40 }
 0x681   :  { %v1647_v28 = vpop.eup %1646 }
 0x682   :  { %v1070_v41 = vadd.f32 1.0, %v1647_v28  ;;  %v1073_v43 = vmul.f32 -0.5, %v1647_v28  ;;  %v1076_v5 = vand.u32 2147483647, %v1647_v28 }
 0x684   :  { %1648 = vlog2.f32 %v1070_v41  ;;  %v1074_v44 = vadd.f32 1.0, %v1073_v43  ;;  %vm1077_vm0 = vcmp.lt.f32.partialorder %v1076_v5, 0.0004427343 }
 0x686   :  { %v1075_v46 = vmul.f32 %v1647_v28, %v1074_v44 }
 0x691   :  { %v1649_v30 = vpop.eup %1648 }
 0x692   :  { %v1072_v35 = vmul.f32 0.6931472, %v1649_v30 }
 0x694   :  { %v1078_v49 = vsel %vm1077_vm0, %v1075_v46, %v1072_v35 }
 0x695   :  { %v1079_v47 = vadd.f32 %v1078_v49, %v1065_v48 }
 0x697   :  { %1650 = vtanh.f32 %v1079_v47 }
 0x6a4   :  { %v1651_v42 = vpop.eup %1650 }
 0x6a5   :  { %v1081_v51 = vmul.f32 %v1651_v42, %v1064_v36 }
 0x6a7   :  { %1503 = vmatmul.mubr.msk.f32.vlgmr.msra.gmra.mxu0 %vm135_vm1, %v1081_v51 }
 0x6a8   :  { %1525 = vmatpush3.msra.mxu0 %v1163_v52  ;;  %1528 = vmatprep.mubr.msk.f32.mxu0 %vm1683_vm14, %v1682_v61 }
 0x6a9   :  { %1526 = vmatprep.subr.mxu0 %v1682_v61 }
 0x6aa   :  { %1527 = vmatpush3.msra.mxu0 %v1162_v54 }
 0x6ab   :  { %1529 = vmatmul.mubr.msk.f32.vlgmr.msra.gmra.mxu0 %vm135_vm1, %v1081_v51  ;;  %vm1172_vm1 = vcmask 523264  }
 0x767   :  { %v1157_v58 = vpop.f32.mrf.mxu0 }
 0x768   :  { %v1158_v53 = vadd.f32 %v1364_v57, %v1157_v58 }
 0x769   :  { %v1504_v59 = vpop.f32.mrf.mxu0 }
 0x76a   :  { %v1161_v18 = vmax.f32 %v1158_v53, 0.0 }
 0x76b   :  { %v1312_v60 = vpop.f32.mrf.mxu0 }
 0x76c   :  { %1522 = vmatmul.mubr.msk.f32.vlgmr.msra.gmra.mxu1 %vm1172_vm1, %v1161_v18 }
 0x76d   :  { %v1530_v29 = vpop.f32.mrf.mxu0 }
 0x82c   :  { %v1242_v38 = vpop.f32.mrf.mxu1 }
 0x82d   :  { %v1313_v61 = vadd.f32 %v1312_v60, %v1242_v38 }
 0x82e   :  { %v1523_v62 = vpop.f32.mrf.mxu1 }
 0x82f   :  { %v1320_v63 = vadd.f32 %v1368_v45, %v1313_v61 }
 0x831   :  { %1322 = vst.msk [vmem:[#allocation2] sm:$0x3] %vm1321_vm2, %v1320_v63 }
 0x832   :  { %1663 = shalt.err (!%p1660_p4)
}
 0x833   :  { %1332 = dma.vmem_to_hbm [thread:$0]  %s1330_s10, 32, %s2089_s3, [#allocation3]  }
 0x834   :  { %1672 = dma.done.wait [#allocation3], 32  }
 0x835   :  { %1673 = vsyncadd [#allocation3], 4294967264 }
 0x836   :  { %1336 = vsyncpa [#allocation3], 1 }

</bundles_post_ra>
